<compile_context>
chip_gen: v6e
topology: v6e:2x2x1
jax: 0.10.0
libtpu: 0.0.40
codegen_flags: <defaults>
</compile_context>

<pallas_src>
import jax
import jax.numpy as jnp
from jax import lax
from jax.experimental import pallas as pl
from jax.experimental.pallas import tpu as pltpu


# --------------------------------------------------------------------------
# Per-generation tuning
# --------------------------------------------------------------------------

def _tpu_generation():
    try:
        kind = jax.devices()[0].device_kind.lower()
    except Exception:
        return "unknown"
    if "v5 lite" in kind or "v5e" in kind or "v5lite" in kind:
        return "v5e"
    if "v5" in kind:
        return "v5p"
    if "v6" in kind:
        return "v6e"
    if "7" in kind:
        return "v7x"
    return "unknown"


_GEN = _tpu_generation()

if _GEN == "v7x":
    _VMEM_LIMIT = 48 * 1024 * 1024      # headroom below the 64 MiB physical VMEM
    _COMPUTE_DTYPE = jnp.bfloat16
    _MSDA_BLOCK_QUERIES = 256
elif _GEN in ("v5e", "v5p"):
    _VMEM_LIMIT = 96 * 1024 * 1024
    _COMPUTE_DTYPE = jnp.float32        # no bf16 VPU: avoid in-kernel casts
    _MSDA_BLOCK_QUERIES = 128           # matches the 128-wide MXU
else:                                    # v6e and default
    _VMEM_LIMIT = 96 * 1024 * 1024
    _COMPUTE_DTYPE = jnp.bfloat16
    _MSDA_BLOCK_QUERIES = 256           # fills the 256-wide MXU M dimension

_LINEAR_BLOCK_ROWS = 512                # mem-bound linears: amortize per-step overhead


# --------------------------------------------------------------------------
# Generic row-tiled linear (used for value_proj).  Weights are used at their
# own dtype: pre-cast them outside, so there is no per-grid-step weight cast.
# --------------------------------------------------------------------------

def _linear_kernel(x_ref, w_ref, b_ref, o_ref):
    x = x_ref[...]
    w = w_ref[...]
    if x.dtype != w.dtype:
        x = x.astype(w.dtype)
    acc = jnp.dot(x, w, preferred_element_type=jnp.float32)
    o_ref[...] = (acc + b_ref[...]).astype(o_ref.dtype)


def linear(x2d, w, b, *, out_dtype, block_rows=_LINEAR_BLOCK_ROWS):
    """x2d: (M, K) @ w: (K, N) + b -> (M, N), tiled over M."""
    M, K = x2d.shape
    N = w.shape[1]
    tm = min(M, block_rows)
    return pl.pallas_call(
        _linear_kernel,
        out_shape=jax.ShapeDtypeStruct((M, N), out_dtype),
        grid=(pl.cdiv(M, tm),),
        in_specs=[
            pl.BlockSpec((tm, K), lambda i: (i, 0)),
            pl.BlockSpec((K, N), lambda i: (0, 0)),
            pl.BlockSpec((1, N), lambda i: (0, 0)),
        ],
        out_specs=pl.BlockSpec((tm, N), lambda i: (i, 0)),
        compiler_params=pltpu.CompilerParams(
            dimension_semantics=("parallel",),
            vmem_limit_bytes=_VMEM_LIMIT),
    )(x2d, w, b.reshape(1, N))


# --------------------------------------------------------------------------
# Fused (query + query_pos) @ [W_offsets(pre-scaled) | W_attn] projection
# --------------------------------------------------------------------------

def _qpos_linear_kernel(q_ref, p_ref, w_ref, b_ref, o_ref):
    w = w_ref[...]
    qp = q_ref[...] + p_ref[...]          # exact f32 add
    if qp.dtype != w.dtype:
        qp = qp.astype(w.dtype)           # bf16 MXU feed on v6e/v7x; no-op on v5e
    o_ref[...] = (jnp.dot(qp, w, preferred_element_type=jnp.float32)
                  + b_ref[...])


def fused_query_projection(q2d, pos2d, w_cat, b_cat,
                           *, block_rows=_LINEAR_BLOCK_ROWS):
    M, K = q2d.shape
    N = w_cat.shape[1]
    tm = min(M, block_rows)
    return pl.pallas_call(
        _qpos_linear_kernel,
        out_shape=jax.ShapeDtypeStruct((M, N), jnp.float32),
        grid=(pl.cdiv(M, tm),),
        in_specs=[
            pl.BlockSpec((tm, K), lambda i: (i, 0)),
            pl.BlockSpec((tm, K), lambda i: (i, 0)),
            pl.BlockSpec((K, N), lambda i: (0, 0)),
            pl.BlockSpec((1, N), lambda i: (0, 0)),
        ],
        out_specs=pl.BlockSpec((tm, N), lambda i: (i, 0)),
        compiler_params=pltpu.CompilerParams(
            dimension_semantics=("parallel",),
            vmem_limit_bytes=_VMEM_LIMIT),
    )(q2d, pos2d, w_cat, b_cat.reshape(1, N))


# --------------------------------------------------------------------------
# Multi-scale deformable sampling core, gridded over (batch, query tiles)
# --------------------------------------------------------------------------

def _make_msda_kernel(spatial_shapes, level_start, nh, L, P, d, interp_dtype):
    n_off = nh * L * P * 2

    def kernel(v_ref, qp_ref, ref_ref, o_ref):
        # v_ref   : (nh, Nv, d) head-major projected value (compute dtype)
        # qp_ref  : (TQ, nh*L*P*3) f32 = [pre-scaled offsets (h,l,{x,y},p) | attn logits (h,l,p)]
        # ref_ref : (TQ, 2*L)     f32 = [ref_x per level | ref_y per level]
        # o_ref   : (TQ, nh*d)
        qp = qp_ref[...]
        ref = ref_ref[...]
        TQ = qp.shape[0]

        # (1, HW) iotas: the broadcast to (TQ, HW) happens inside the compares,
        # so no TQ-sized int32 tensor stays live across the kernel.
        iotas = [lax.broadcasted_iota(jnp.int32, (1, H * W), 1)
                 for (H, W) in spatial_shapes]

        for h in range(nh):
            # softmax over the L*P samples of this head (EUP exp + approx recip).
            lg = qp[:, n_off + h * L * P: n_off + (h + 1) * L * P]
            m = jnp.max(lg, axis=-1, keepdims=True)
            e = jnp.exp(lg - m)
            w_h = e * pl.reciprocal(jnp.sum(e, axis=-1, keepdims=True), approx=True)

            acc = jnp.zeros((TQ, d), jnp.float32)
            for l, (H, W) in enumerate(spatial_shapes):
                HW = H * W
                s0 = level_start[l]
                v_lh = v_ref[h, s0:s0 + HW, :]                       # (HW, d) contiguous

                base = (h * L + l) * 2 * P
                # offsets were pre-scaled by 1/W_l (x) and 1/H_l (y) in the weights.
                xs = (ref[:, l:l + 1] + qp[:, base:base + P]) * W - 0.5          # (TQ,P)
                ys = (ref[:, L + l:L + l + 1] + qp[:, base + P:base + 2 * P]) * H - 0.5
                x0f = jnp.floor(xs)
                y0f = jnp.floor(ys)
                wx = xs - x0f
                wy = ys - y0f
                x0 = x0f.astype(jnp.int32)
                y0 = y0f.astype(jnp.int32)
                wq = w_h[:, l * P:(l + 1) * P]                        # (TQ,P)

                # OOB corners get zero weight (== grid_sample padding_mode='zeros');
                # all masking lives on the small (TQ,P) side.
                vx0 = (x0 >= 0) & (x0 < W)
                vx1 = (x0 >= -1) & (x0 < W - 1)
                vy0 = (y0 >= 0) & (y0 < H)
                vy1 = (y0 >= -1) & (y0 < H - 1)
                w00 = jnp.where(vx0 & vy0, (1.0 - wx) * (1.0 - wy) * wq, 0.0).astype(interp_dtype)
                w10 = jnp.where(vx1 & vy0, wx * (1.0 - wy) * wq, 0.0).astype(interp_dtype)
                w01 = jnp.where(vx0 & vy1, (1.0 - wx) * wy * wq, 0.0).astype(interp_dtype)
                w11 = jnp.where(vx1 & vy1, wx * wy * wq, 0.0).astype(interp_dtype)
                f00 = y0 * W + x0                                     # (TQ,P) int32
                f10 = f00 + 1
                f01 = f00 + W
                f11 = f00 + W + 1

                iota = iotas[l]
                Mw = None
                for p in range(P):
                    # all four corners of one point folded into a single select
                    # chain -> one Mw accumulation sweep per point (corner flats
                    # are distinct for any level with H,W >= 2).
                    contrib = jnp.where(
                        iota == f00[:, p:p + 1], w00[:, p:p + 1],
                        jnp.where(iota == f10[:, p:p + 1], w10[:, p:p + 1],
                                  jnp.where(iota == f01[:, p:p + 1], w01[:, p:p + 1],
                                            jnp.where(iota == f11[:, p:p + 1],
                                                      w11[:, p:p + 1], 0.0))))
                    Mw = contrib if Mw is None else Mw + contrib

                # TODO(synk): replace this interpolation-matrix matmul with an
                # in-kernel row gather / per-level DMA once that form lowers
                # reliably on Mosaic (cuts MXU work by ~HW/(4P)).
                acc = acc + jnp.dot(Mw, v_lh, preferred_element_type=jnp.float32)

            # store this head's channels directly (no staging scratch).
            o_ref[:, h * d:(h + 1) * d] = acc.astype(o_ref.dtype)

    return kernel


def msda_core(v_hm, qproj, ref2, *, spatial_shapes, level_start, nh, L, P, d,
              block_queries=_MSDA_BLOCK_QUERIES):
    B, _, Nv, _ = v_hm.shape
    Nq = qproj.shape[1]
    K3 = qproj.shape[2]
    C = nh * d
    tq = min(Nq, block_queries)
    kernel = _make_msda_kernel(spatial_shapes, level_start, nh, L, P, d,
                               v_hm.dtype)
    # TODO(synk): for production Nv keep the value block in HBM
    # (memory_space=pl.ANY) with per-level DMA, or single-buffer it with
    # pipeline_mode=pl.Buffered(1) since its block index only changes with b.
    return pl.pallas_call(
        kernel,
        out_shape=jax.ShapeDtypeStruct((B, Nq, C), v_hm.dtype),
        grid=(B, pl.cdiv(Nq, tq)),
        in_specs=[
            # head-major value block only changes with b -> resident across q tiles.
            pl.BlockSpec((None, nh, Nv, d), lambda b, t: (b, 0, 0, 0)),
            pl.BlockSpec((None, tq, K3), lambda b, t: (b, t, 0)),
            pl.BlockSpec((None, tq, 2 * L), lambda b, t: (b, t, 0)),
        ],
        out_specs=pl.BlockSpec((None, tq, C), lambda b, t: (b, t, 0)),
        compiler_params=pltpu.CompilerParams(
            dimension_semantics=("parallel", "parallel"),
            vmem_limit_bytes=_VMEM_LIMIT),
    )(v_hm, qproj, ref2)


# --------------------------------------------------------------------------
# Fused output_proj + residual + LayerNorm epilogue
# --------------------------------------------------------------------------

def _outproj_ln_kernel(c_ref, q_ref, w_ref, b_ref, g_ref, beta_ref, o_ref):
    c = c_ref[...]
    w = w_ref[...]
    if c.dtype != w.dtype:
        c = c.astype(w.dtype)
    x = jnp.dot(c, w, preferred_element_type=jnp.float32) + b_ref[...]
    # MSDeformAttn returns output_proj(core) + identity (identity == query,
    # dropout is a no-op in eval); the layer adds query again before LayerNorm.
    s = x + 2.0 * q_ref[...]
    mu = jnp.mean(s, axis=-1, keepdims=True)
    var = jnp.mean(jnp.square(s - mu), axis=-1, keepdims=True)
    o_ref[...] = (s - mu) * lax.rsqrt(var + 1e-5) * g_ref[...] + beta_ref[...]


def output_proj_residual_layernorm(core2d, q2d, w, b, gamma, beta,
                                   *, block_rows=_LINEAR_BLOCK_ROWS):
    M, C = q2d.shape
    tm = min(M, block_rows)
    return pl.pallas_call(
        _outproj_ln_kernel,
        out_shape=jax.ShapeDtypeStruct((M, C), jnp.float32),
        grid=(pl.cdiv(M, tm),),
        in_specs=[
            pl.BlockSpec((tm, C), lambda i: (i, 0)),
            pl.BlockSpec((tm, C), lambda i: (i, 0)),
            pl.BlockSpec((C, C), lambda i: (0, 0)),
            pl.BlockSpec((1, C), lambda i: (0, 0)),
            pl.BlockSpec((1, C), lambda i: (0, 0)),
            pl.BlockSpec((1, C), lambda i: (0, 0)),
        ],
        out_specs=pl.BlockSpec((tm, C), lambda i: (i, 0)),
        compiler_params=pltpu.CompilerParams(
            dimension_semantics=("parallel",),
            vmem_limit_bytes=_VMEM_LIMIT),
    )(core2d, q2d, w, b.reshape(1, C), gamma.reshape(1, C), beta.reshape(1, C))


# --------------------------------------------------------------------------
# Full layer forward (glue in plain JAX; hot paths in Pallas)
# --------------------------------------------------------------------------

def _prescale_offset_params(wo, bo, spatial_shapes, nh, L, P):
    """Permute offset columns from (h,l,p,{x,y}) to (h,l,{x,y},p) order and fold
    the 1/[W_l, H_l] normalizer in, so sampling coords are formed in-kernel
    from contiguous lane slices of the fused projection."""
    perm = jnp.arange(nh * L * P * 2).reshape(nh, L, P, 2).transpose(0, 1, 3, 2).reshape(-1)
    inv = jnp.array([[1.0 / W, 1.0 / H] for (H, W) in spatial_shapes], jnp.float32)  # (L,2)
    scale = jnp.broadcast_to(inv[None, :, :, None], (nh, L, 2, P)).reshape(-1)
    return wo[:, perm] * scale[None, :], bo[perm] * scale


def deformable_transformer_layer(params, query, value, query_pos, ref_pts,
                                 spatial_shapes, level_start, *, nh, L, P):
    B, Nq, C = query.shape
    Nv = value.shape[1]
    d = C // nh
    cdt = _COMPUTE_DTYPE

    # pre-cast weights once (no per-grid-step weight casts inside kernels).
    wv = params["wv"].astype(cdt)
    wout = params["wout"].astype(cdt)

    # value projection -> head-major (B, nh, Nv, d): one XLA transpose so the
    # per-head access inside the sampling kernel is a contiguous block.
    v_proj = linear(value.reshape(B * Nv, C), wv, params["bv"], out_dtype=cdt)
    v_hm = jnp.transpose(v_proj.reshape(B, Nv, nh, d), (0, 2, 1, 3))

    # fused (query + query_pos) @ [W_offsets(pre-scaled) | W_attn] projection.
    pos = query_pos if query_pos is not None else jnp.zeros_like(query)
    wo_s, bo_s = _prescale_offset_params(params["wo"], params["bo"],
                                         spatial_shapes, nh, L, P)
    w_cat = jnp.concatenate([wo_s, params["wa"]], axis=1).astype(cdt)
    b_cat = jnp.concatenate([bo_s, params["ba"]], axis=0)
    qproj = fused_query_projection(query.reshape(B * Nq, C),
                                   pos.reshape(B * Nq, C),
                                   w_cat, b_cat).reshape(B, Nq, -1)

    # reference points reordered to [x_0..x_{L-1} | y_0..y_{L-1}] lanes.
    ref2 = jnp.transpose(ref_pts, (0, 1, 3, 2)).reshape(B, Nq, 2 * L)

    core = msda_core(v_hm, qproj, ref2,
                     spatial_shapes=spatial_shapes, level_start=level_start,
                     nh=nh, L=L, P=P, d=d)                            # (B,Nq,C)

    y = output_proj_residual_layernorm(
        core.reshape(B * Nq, C), query.reshape(B * Nq, C),
        wout, params["bout"], params["ln_g"], params["ln_b"])
    return y.reshape(B, Nq, C)


# --------------------------------------------------------------------------
# Pure-JAX reference (independent gather-based formulation, f32)
# --------------------------------------------------------------------------

def _ref_msda_core(v, lx, ly, aw, *, spatial_shapes, level_start, nh, L, P, d):
    Nq = lx.shape[0]
    out = jnp.zeros((Nq, nh * d), jnp.float32)
    for h in range(nh):
        w_h = jax.nn.softmax(aw[:, h * L * P:(h + 1) * L * P], axis=-1)
        acc = jnp.zeros((Nq, d), jnp.float32)
        for l, (H, W) in enumerate(spatial_shapes):
            s0 = level_start[l]
            v_l = v[s0:s0 + H * W, h * d:(h + 1) * d].reshape(H, W, d)
            for p in range(P):
                col = h * L * P + l * P + p
                x = lx[:, col] * W - 0.5
                y = ly[:, col] * H - 0.5
                x0 = jnp.floor(x)
                y0 = jnp.floor(y)
                wp = w_h[:, l * P + p]
                for dx in (0, 1):
                    for dy in (0, 1):
                        cx = x0 + dx
                        cy = y0 + dy
                        wgt = (1.0 - jnp.abs(x - cx)) * (1.0 - jnp.abs(y - cy))
                        valid = ((cx >= 0) & (cx <= W - 1) &
                                 (cy >= 0) & (cy <= H - 1))
                        cxi = jnp.clip(cx.astype(jnp.int32), 0, W - 1)
                        cyi = jnp.clip(cy.astype(jnp.int32), 0, H - 1)
                        val = v_l[cyi, cxi]                          # (Nq, d)
                        coef = jnp.where(valid, wgt * wp, 0.0)[:, None]
                        acc = acc + coef * val
        out = out.at[:, h * d:(h + 1) * d].set(acc)
    return out


def reference_forward(params, query, value, query_pos, ref_pts,
                      spatial_shapes, level_start, *, nh, L, P):
    B, Nq, C = query.shape
    d = C // nh
    q = query + query_pos
    v_proj = value @ params["wv"] + params["bv"]
    offsets = (q @ params["wo"] + params["bo"]).reshape(B, Nq, nh, L, P, 2)
    aw_logits = (q @ params["wa"] + params["ba"]).reshape(B, Nq, nh * L * P)
    normalizer = jnp.array([[W, H] for (H, W) in spatial_shapes], jnp.float32)
    locs = (ref_pts[:, :, None, :, None, :]
            + offsets / normalizer[None, None, None, :, None, :])
    lx = locs[..., 0].reshape(B, Nq, nh * L * P)
    ly = locs[..., 1].reshape(B, Nq, nh * L * P)
    core = jnp.stack([
        _ref_msda_core(v_proj[b], lx[b], ly[b], aw_logits[b],
                       spatial_shapes=spatial_shapes, level_start=level_start,
                       nh=nh, L=L, P=P, d=d)
        for b in range(B)])
    out = core @ params["wout"] + params["bout"]
    s = query + (out + query)
    mu = s.mean(-1, keepdims=True)
    var = ((s - mu) ** 2).mean(-1, keepdims=True)
    return (s - mu) / jnp.sqrt(var + 1e-5) * params["ln_g"] + params["ln_b"]


# --------------------------------------------------------------------------

if __name__ == "__main__":
    # Small deterministic test configuration.
    B, Nq, C = 2, 8, 32
    nh, L, P = 4, 2, 4
    spatial_shapes = ((8, 8), (4, 4))            # (H, W) per level (static)
    level_start = []
    _s = 0
    for (H, W) in spatial_shapes:
        level_start.append(_s)
        _s += H * W
    level_start = tuple(level_start)
    Nv = _s                                       # 80

    key = jax.random.PRNGKey(0)
    ks = jax.random.split(key, 12)
    query = jax.random.normal(ks[0], (B, Nq, C), jnp.float32)
    value = jax.random.normal(ks[1], (B, Nv, C), jnp.float32)
    query_pos = 0.1 * jax.random.normal(ks[2], (B, Nq, C), jnp.float32)
    ref_pts = jax.random.uniform(ks[3], (B, Nq, L, 2), jnp.float32)

    def init_w(k, shape, scale=0.1):
        return scale * jax.random.normal(k, shape, jnp.float32)

    # Deterministic synthetic parameters (shapes from the module's __init__).
    # TODO(synk): mmcv's special grid-init for sampling_offsets bias and the
    # zero-init of attention_weights are replaced by random init so the test
    # exercises non-trivial sampling locations.
    params = {
        "wv": init_w(ks[4], (C, C)),              "bv": init_w(ks[5], (C,)),
        "wo": init_w(ks[6], (C, nh * L * P * 2)), "bo": init_w(ks[7], (nh * L * P * 2,)),
        "wa": init_w(ks[8], (C, nh * L * P)),     "ba": init_w(ks[9], (nh * L * P,)),
        "wout": init_w(ks[10], (C, C)),           "bout": init_w(ks[11], (C,)),
        "ln_g": jnp.ones((C,), jnp.float32),      "ln_b": jnp.zeros((C,), jnp.float32),
    }

    out = deformable_transformer_layer(
        params, query, value, query_pos, ref_pts,
        spatial_shapes, level_start, nh=nh, L=L, P=P)
    out = jax.block_until_ready(out)

    ref = reference_forward(
        params, query, value, query_pos, ref_pts,
        spatial_shapes, level_start, nh=nh, L=L, P=P)

    assert out.shape == (B, Nq, C), out.shape
    max_err = float(jnp.max(jnp.abs(out - ref)))
    assert max_err < 5e-2, f"mismatch vs JAX reference: {max_err}"
    print("KERNEL_OK")
</pallas_src>

<mosaic_0001>
module attributes {stable_mosaic.version = 11 : i64} {
  func.func @_linear_kernel(%arg0: i32, %arg1: memref<160x32xf32, #tpu.memory_space<vmem>>, %arg2: memref<32x32xbf16, #tpu.memory_space<vmem>>, %arg3: memref<1x32xf32, #tpu.memory_space<vmem>>, %arg4: memref<160x32xbf16, #tpu.memory_space<vmem>>) attributes {dimension_semantics = [#tpu.dimension_semantics<parallel>], iteration_bounds = array<i64: 1>, scalar_prefetch = 0 : i64, scratch_operands = 0 : i64, tpu.core_type = #tpu.core_type<tc>, window_params = [{transform_indices = @transform_0, window_bounds = array<i64: 160, 32>}, {pipeline_mode = #tpu.pipeline_mode<synchronous>, transform_indices = @transform_1, window_bounds = array<i64: 32, 32>}, {pipeline_mode = #tpu.pipeline_mode<synchronous>, transform_indices = @transform_2, window_bounds = array<i64: 1, 32>}, {transform_indices = @transform_3, window_bounds = array<i64: 160, 32>}]} {
    %c0 = arith.constant 0 : index
    %c0_0 = arith.constant 0 : index
    %0 = vector.load %arg1[%c0, %c0_0] : memref<160x32xf32, #tpu.memory_space<vmem>>, vector<160x32xf32>
    %c0_1 = arith.constant 0 : index
    %c0_2 = arith.constant 0 : index
    %1 = vector.load %arg2[%c0_1, %c0_2] : memref<32x32xbf16, #tpu.memory_space<vmem>>, vector<32x32xbf16>
    %2 = arith.truncf %0 : vector<160x32xf32> to vector<160x32xbf16>
    %cst = arith.constant dense<0.000000e+00> : vector<160x32xf32>
    %3 = tpu.matmul %2, %1, %cst {dimension_numbers = #tpu.dot_dimension_numbers<[1], [0], [0], [1], [0, 0, 1, 1], [], []>} : vector<160x32xbf16>, vector<32x32xbf16>, vector<160x32xf32> -> vector<160x32xf32>
    %c0_3 = arith.constant 0 : index
    %c0_4 = arith.constant 0 : index
    %4 = vector.load %arg3[%c0_3, %c0_4] : memref<1x32xf32, #tpu.memory_space<vmem>>, vector<1x32xf32>
    %5 = vector.broadcast %4 : vector<1x32xf32> to vector<160x32xf32>
    %6 = arith.addf %3, %5 : vector<160x32xf32>
    %7 = arith.truncf %6 : vector<160x32xf32> to vector<160x32xbf16>
    %c0_5 = arith.constant 0 : index
    %c0_6 = arith.constant 0 : index
    %8 = vector.load %arg4[%c0_5, %c0_6] : memref<160x32xbf16, #tpu.memory_space<vmem>>, vector<160x32xbf16>
    tpu.vector_store %arg4[%c0_5, %c0_6], %7 {strides = array<i32>} : memref<160x32xbf16, #tpu.memory_space<vmem>>, vector<160x32xbf16>,
    return
  }
  func.func @transform_0(%arg0: i32) -> (i32, i32) {
    %c0_i32 = arith.constant 0 : i32
    %c0_i32_0 = arith.constant 0 : i32
    return %arg0, %c0_i32 : i32, i32
  }
  func.func @transform_1(%arg0: i32) -> (i32, i32) {
    %c0_i32 = arith.constant 0 : i32
    %c0_i32_0 = arith.constant 0 : i32
    %c0_i32_1 = arith.constant 0 : i32
    return %c0_i32, %c0_i32_0 : i32, i32
  }
  func.func @transform_2(%arg0: i32) -> (i32, i32) {
    %c0_i32 = arith.constant 0 : i32
    %c0_i32_0 = arith.constant 0 : i32
    %c0_i32_1 = arith.constant 0 : i32
    return %c0_i32, %c0_i32_0 : i32, i32
  }
  func.func @transform_3(%arg0: i32) -> (i32, i32) {
    %c0_i32 = arith.constant 0 : i32
    %c0_i32_0 = arith.constant 0 : i32
    return %arg0, %c0_i32 : i32, i32
  }
}

</mosaic_0001>

<bundles_post_ra>
// kernel: tpu_custom_call.1
= control target key start
LH: loop header
LB: loop body
LE: loop exit
PB: predicated region body
PF: predicated region fallthrough
CT: control target
= control target key end

     0   :  { %vm68_vm0 = vcmask 261120   ;;  %vm292_vm1 = vcmask 257024   ;;  %s613_s1 = inlined_call_operand.vmem [shape: bf16[32,32], index: 1, kind: input, shape index: {}]   ;;  %s614_s0 = inlined_call_operand.vmem [shape: f32[160,32], index: 0, kind: input, shape index: {}]   ;;  %s615_s2 = inlined_call_operand.vmem [shape: f32[1,32], index: 2, kind: input, shape index: {}]   ;;  %s616_s3 = inlined_call_operand.vmem [shape: bf16[160,32], index: 3, kind: output, shape index: {}]  }
   0x1   :  { %v410_v0 = vld [vmem:[%s613_s1 + $0x8] sm:$0xff]   ;;  %v411_v1 = vld [vmem:[%s613_s1] sm:$0xff]   ;;  %v17_v4 = vld [vmem:[%s614_s0 + $0x10] sm:$0xff] }
   0x2   :  { %382 = vmatprep.subr.bf16.mxu0 %v410_v0  ;;  %406 = vmatprep.subr.bf16.mxu1 %v410_v0  ;;  %v15_v2 = vld [vmem:[%s614_s0] sm:$0xff]  ;;  %v16_v3 = vld [vmem:[%s614_s0 + $0x8] sm:$0xff]  ;;  %v18_v6 = vld [vmem:[%s614_s0 + $0x18] sm:$0xff] }
   0x3   :  { %383 = vmatpush3.bf16.msra.mxu0 %v410_v0  ;;  %408 = vmatpush3.bf16.msra.mxu1 %v410_v0  ;;  %v39_v5 = vpack.c.bf16 %v16_v3, %v15_v2  ;;  %v27_v7 = vld [vmem:[%s614_s0 + $0x60] sm:$0xff]  ;;  %v28_v8 = vld [vmem:[%s614_s0 + $0x68] sm:$0xff]  ;;  %v29_v10 = vld [vmem:[%s614_s0 + $0x70] sm:$0xff]  ;;  %v40_v14 = vpack.c.bf16 %v18_v6, %v17_v4 }
   0x4   :  { %384 = vmatprep.subr.bf16.mxu0 %v411_v1  ;;  %407 = vmatprep.subr.bf16.mxu1 %v411_v1  ;;  %v45_v9 = vpack.c.bf16 %v28_v8, %v27_v7  ;;  %v30_v11 = vld [vmem:[%s614_s0 + $0x78] sm:$0xff]  ;;  %v19_v12 = vld [vmem:[%s614_s0 + $0x20] sm:$0xff]  ;;  %v20_v13 = vld [vmem:[%s614_s0 + $0x28] sm:$0xff] }
   0x5   :  { %386 = vmatprep.mubr.msk.bf16.mxu0 %vm68_vm0, %v39_v5  ;;  %v46_v15 = vpack.c.bf16 %v30_v11, %v29_v10  ;;  %v31_v16 = vld [vmem:[%s614_s0 + $0x80] sm:$0xff]  ;;  %v32_v17 = vld [vmem:[%s614_s0 + $0x88] sm:$0xff]  ;;  %v41_v18 = vpack.c.bf16 %v20_v13, %v19_v12  ;;  %v21_v20 = vld [vmem:[%s614_s0 + $0x30] sm:$0xff] }
   0x6   :  { %398 = vmatprep.mubr.msk.bf16.mxu1 %vm68_vm0, %v45_v9  ;;  %v47_v19 = vpack.c.bf16 %v32_v17, %v31_v16  ;;  %v22_v21 = vld [vmem:[%s614_s0 + $0x38] sm:$0xff]  ;;  %v33_v22 = vld [vmem:[%s614_s0 + $0x90] sm:$0xff]  ;;  %v23_v24 = vld [vmem:[%s614_s0 + $0x40] sm:$0xff] }
   0x7   :  { %385 = vmatpush3.bf16.msra.mxu0 %v411_v1  ;;  %409 = vmatpush3.bf16.msra.mxu1 %v411_v1  ;;  %v34_v23 = vld [vmem:[%s614_s0 + $0x98] sm:$0xff]  ;;  %v24_v25 = vld [vmem:[%s614_s0 + $0x48] sm:$0xff]  ;;  %v42_v26 = vpack.c.bf16 %v22_v21, %v21_v20  ;;  %v25_v29 = vld [vmem:[%s614_s0 + $0x50] sm:$0xff] }
   0x8   :  { %v48_v27 = vpack.c.bf16 %v34_v23, %v33_v22  ;;  %v43_v28 = vpack.c.bf16 %v24_v25, %v23_v24  ;;  %v26_v30 = vld [vmem:[%s614_s0 + $0x58] sm:$0xff]  ;;  %v511_v32 = vld [vmem:[%s615_s2] ss:$0 sm:$0xff] }
   0x9   :  { %v44_v31 = vpack.c.bf16 %v26_v30, %v25_v29 }
   0xa   :  { %387 = vmatmul.mubr.msk.bf16.vlgmr.msra.gmra.mxu0 %vm68_vm0, %v40_v14  ;;  %399 = vmatmul.mubr.msk.bf16.vlgmr.msra.gmra.mxu1 %vm68_vm0, %v46_v15 }
   0xb   :  { %390 = vmatprep.mubr.msk.bf16.mxu0 %vm68_vm0, %v41_v18  ;;  %402 = vmatprep.mubr.msk.bf16.mxu1 %vm68_vm0, %v47_v19 }
  0x12   :  { %391 = vmatmul.mubr.msk.bf16.gmra.mxu0 %vm68_vm0, %v42_v26  ;;  %403 = vmatmul.mubr.msk.bf16.gmra.mxu1 %vm68_vm0, %v48_v27 }
  0x13   :  { %394 = vmatprep.mubr.msk.bf16.mxu0 %vm68_vm0, %v43_v28 }
  0x1a   :  { %395 = vmatmul.mubr.msk.bf16.gmra.mxu0 %vm68_vm0, %v44_v31 }
  0xca   :  { %v388_v33 = vpop.f32.mrf.mxu0  ;;  %v400_v34 = vpop.f32.mrf.mxu1 }
  0xcb   :  { %v142_v35 = vadd.f32 %v388_v33, %v511_v32  ;;  %v190_v36 = vadd.f32 %v400_v34, %v511_v32 }
  0xcc   :  { %v133_v37 = vpop.f32.mrf.mxu0  ;;  %v181_v38 = vpop.f32.mrf.mxu1 }
  0xcd   :  { %v352_v39 = vpack.c.bf16 %v142_v35, %v142_v35  ;;  %v134_v40 = vadd.f32 %v511_v32, %v133_v37  ;;  %v364_v41 = vpack.c.bf16 %v190_v36, %v190_v36  ;;  %v182_v42 = vadd.f32 %v511_v32, %v181_v38 }
  0xce   :  { %v389_v43 = vpop.f32.mrf.mxu0  ;;  %v401_v44 = vpop.f32.mrf.mxu1 }
  0xcf   :  { %295 = vst.msk [vmem:[%s616_s3 + $0x8] sm:$0xf] %vm292_vm1, %v352_v39  ;;  %v350_v45 = vpack.c.bf16 %v134_v40, %v134_v40  ;;  %307 = vst.msk [vmem:[%s616_s3 + $0x38] sm:$0xf] %vm292_vm1, %v364_v41  ;;  %v145_v46 = vadd.f32 %v389_v43, %v511_v32  ;;  %v362_v47 = vpack.c.bf16 %v182_v42, %v182_v42 }
  0xd0   :  { %v193_v48 = vadd.f32 %v401_v44, %v511_v32  ;;  %v136_v49 = vpop.f32.mrf.mxu0  ;;  %v184_v50 = vpop.f32.mrf.mxu1 }
  0xd1   :  { %293 = vst.msk [vmem:[%s616_s3] sm:$0xf] %vm292_vm1, %v350_v45  ;;  %v353_v51 = vpack.c.bf16 %v145_v46, %v145_v46  ;;  %305 = vst.msk [vmem:[%s616_s3 + $0x30] sm:$0xf] %vm292_vm1, %v362_v47  ;;  %v137_v52 = vadd.f32 %v511_v32, %v136_v49  ;;  %v185_v54 = vadd.f32 %v511_v32, %v184_v50 }
  0xd2   :  { %v365_v53 = vpack.c.bf16 %v193_v48, %v193_v48  ;;  %v392_v55 = vpop.f32.mrf.mxu0  ;;  %v404_v56 = vpop.f32.mrf.mxu1 }
  0xd3   :  { %296 = vst.msk [vmem:[%s616_s3 + $0xc] sm:$0xf] %vm292_vm1, %v353_v51  ;;  %v351_v57 = vpack.c.bf16 %v137_v52, %v137_v52  ;;  %v158_v58 = vadd.f32 %v392_v55, %v511_v32  ;;  %v363_v59 = vpack.c.bf16 %v185_v54, %v185_v54  ;;  %v206_v60 = vadd.f32 %v404_v56, %v511_v32 }
  0xd4   :  { %308 = vst.msk [vmem:[%s616_s3 + $0x3c] sm:$0xf] %vm292_vm1, %v365_v53  ;;  %v149_v61 = vpop.f32.mrf.mxu0  ;;  %v197_v62 = vpop.f32.mrf.mxu1 }
  0xd5   :  { %294 = vst.msk [vmem:[%s616_s3 + $0x4] sm:$0xf] %vm292_vm1, %v351_v57  ;;  %v356_v63 = vpack.c.bf16 %v158_v58, %v158_v58  ;;  %306 = vst.msk [vmem:[%s616_s3 + $0x34] sm:$0xf] %vm292_vm1, %v363_v59  ;;  %v150_v0 = vadd.f32 %v511_v32, %v149_v61  ;;  %v368_v1 = vpack.c.bf16 %v206_v60, %v206_v60 }
  0xd6   :  { %v198_v2 = vadd.f32 %v511_v32, %v197_v62  ;;  %v393_v3 = vpop.f32.mrf.mxu0  ;;  %v405_v4 = vpop.f32.mrf.mxu1 }
  0xd7   :  { %299 = vst.msk [vmem:[%s616_s3 + $0x18] sm:$0xf] %vm292_vm1, %v356_v63  ;;  %v354_v5 = vpack.c.bf16 %v150_v0, %v150_v0  ;;  %311 = vst.msk [vmem:[%s616_s3 + $0x48] sm:$0xf] %vm292_vm1, %v368_v1  ;;  %v161_v6 = vadd.f32 %v393_v3, %v511_v32  ;;  %v209_v8 = vadd.f32 %v405_v4, %v511_v32 }
  0xd8   :  { %v366_v7 = vpack.c.bf16 %v198_v2, %v198_v2  ;;  %v152_v9 = vpop.f32.mrf.mxu0  ;;  %v200_v10 = vpop.f32.mrf.mxu1 }
  0xd9   :  { %297 = vst.msk [vmem:[%s616_s3 + $0x10] sm:$0xf] %vm292_vm1, %v354_v5  ;;  %v357_v11 = vpack.c.bf16 %v161_v6, %v161_v6  ;;  %v153_v12 = vadd.f32 %v511_v32, %v152_v9  ;;  %v369_v13 = vpack.c.bf16 %v209_v8, %v209_v8  ;;  %v201_v14 = vadd.f32 %v511_v32, %v200_v10 }
  0xda   :  { %309 = vst.msk [vmem:[%s616_s3 + $0x40] sm:$0xf] %vm292_vm1, %v366_v7  ;;  %v396_v15 = vpop.f32.mrf.mxu0 }
  0xdb   :  { %300 = vst.msk [vmem:[%s616_s3 + $0x1c] sm:$0xf] %vm292_vm1, %v357_v11  ;;  %v355_v16 = vpack.c.bf16 %v153_v12, %v153_v12  ;;  %312 = vst.msk [vmem:[%s616_s3 + $0x4c] sm:$0xf] %vm292_vm1, %v369_v13  ;;  %v174_v17 = vadd.f32 %v396_v15, %v511_v32  ;;  %v367_v18 = vpack.c.bf16 %v201_v14, %v201_v14 }
  0xdc   :  { %v165_v19 = vpop.f32.mrf.mxu0 }
  0xdd   :  { %298 = vst.msk [vmem:[%s616_s3 + $0x14] sm:$0xf] %vm292_vm1, %v355_v16  ;;  %v360_v20 = vpack.c.bf16 %v174_v17, %v174_v17  ;;  %310 = vst.msk [vmem:[%s616_s3 + $0x44] sm:$0xf] %vm292_vm1, %v367_v18  ;;  %v166_v21 = vadd.f32 %v511_v32, %v165_v19 }
  0xde   :  { %v397_v22 = vpop.f32.mrf.mxu0 }
  0xdf   :  { %303 = vst.msk [vmem:[%s616_s3 + $0x28] sm:$0xf] %vm292_vm1, %v360_v20  ;;  %v358_v23 = vpack.c.bf16 %v166_v21, %v166_v21  ;;  %v177_v24 = vadd.f32 %v397_v22, %v511_v32 }
  0xe0   :  { %v168_v25 = vpop.f32.mrf.mxu0 }
  0xe1   :  { %301 = vst.msk [vmem:[%s616_s3 + $0x20] sm:$0xf] %vm292_vm1, %v358_v23  ;;  %v361_v26 = vpack.c.bf16 %v177_v24, %v177_v24  ;;  %v169_v27 = vadd.f32 %v511_v32, %v168_v25 }
  0xe3   :  { %304 = vst.msk [vmem:[%s616_s3 + $0x2c] sm:$0xf] %vm292_vm1, %v361_v26  ;;  %v359_v28 = vpack.c.bf16 %v169_v27, %v169_v27 }
  0xe5   :  { %302 = vst.msk [vmem:[%s616_s3 + $0x24] sm:$0xf] %vm292_vm1, %v359_v28 }

</bundles_post_ra>
